<compile_context>
chip_gen: v7x
topology: tpu7x:2x2x1
jax: 0.10.0
libtpu: 0.0.40
codegen_flags: <defaults>
</compile_context>

<pallas_src>
import jax
import jax.numpy as jnp
from jax.experimental import pallas as pl
from jax.experimental.pallas import tpu as pltpu


def _round_up(x, m):
    return (x + m - 1) // m * m


def _crelu_kernel(x_ref, o_ref):
    # x_ref: (tile_r, tile_l); o_ref: (2, tile_r, tile_l).
    x = x_ref[...]
    o_ref[0] = jnp.maximum(x, 0)
    o_ref[1] = jnp.maximum(-x, 0)


def _hw_budget():
    """(per-step HBM traffic target, vmem_limit_bytes), generation-aware."""
    cap = 64 << 20                        # conservative default (v7x physical VMEM)
    try:
        cap = int(getattr(pltpu.get_tpu_info(), "vmem_capacity_bytes", cap))
    except Exception:
        pass
    if cap >= (100 << 20):                # v5e / v6e: 128 MiB physical VMEM
        return 16 << 20, 48 << 20
    return 12 << 20, 40 << 20             # v7x: 64 MiB physical VMEM


def _shrink_for_steps(extent, tile, granule, other_steps):
    """Shrink `tile` (a multiple of `granule`) so the total grid-step count
    other_steps * cdiv(extent, tile) is >= 4 and, while it is small, even
    (>= 2 blocks per v7x TensorCore; keeps DMA double-buffering busy)."""

    def total(t):
        return other_steps * pl.cdiv(extent, t)

    while tile > granule and (
        total(tile) < 4 or (total(tile) % 2 == 1 and total(tile) < 8)
    ):
        nxt = _round_up(pl.cdiv(extent, pl.cdiv(extent, tile) + 1), granule)
        if nxt >= tile:
            nxt = tile - granule
        tile = max(granule, nxt)
    return tile


def _choose_layout_and_tiles(n, c, hw, itemsize, target_step_bytes):
    """Return (rows, lanes, tile_r, tile_l) for the (N, rows, lanes) view."""
    p = c * hw
    if p % (8 * 128) == 0:
        # Dense path: fully packed (8,128) tiles, independent of channel count.
        rows, lanes = p // 128, 128
        tile_l = 128
        per_row_bytes = 3 * 128 * itemsize            # 1 read + 2 writes
        tile_r = max(8, (target_step_bytes // per_row_bytes) // 8 * 8)
        tile_r = min(tile_r, _round_up(rows, 8))
        tile_r = _shrink_for_steps(rows, tile_r, 8, n)
        return rows, lanes, tile_r, tile_l

    # Fallback: channels on sublanes, tile the (padded) lane axis.
    rows, lanes = c, hw
    if 3 * rows * 128 * itemsize > target_step_bytes:
        # Guard for very large channel counts: tile the channel axis too.
        tile_r = max(8, (target_step_bytes // (3 * 128 * itemsize)) // 8 * 8)
        tile_l = 128
    else:
        tile_r = rows
        cap_l = max(128, (target_step_bytes // (3 * rows * itemsize)) // 128 * 128)
        tile_l = min(_round_up(lanes, 128), cap_l)
    tile_l = _shrink_for_steps(lanes, tile_l, 128, n * pl.cdiv(rows, tile_r))
    return rows, lanes, tile_r, tile_l


def crelu(x, *, target_step_bytes=None, vmem_limit_bytes=None):
    """CReLU: (N, C, H, W) -> (N, 2C, H, W); out = relu(concat([x, -x], 1))."""
    n, c, h, w = x.shape
    hw = h * w
    itemsize = jnp.dtype(x.dtype).itemsize

    auto_target, auto_vmem = _hw_budget()
    target = target_step_bytes if target_step_bytes is not None else auto_target
    vmem_limit = vmem_limit_bytes if vmem_limit_bytes is not None else auto_vmem

    rows, lanes, tile_r, tile_l = _choose_layout_and_tiles(
        n, c, hw, itemsize, target
    )

    x3 = x.reshape(n, rows, lanes)            # pure view for contiguous NCHW
    grid = (n, pl.cdiv(rows, tile_r), pl.cdiv(lanes, tile_l))

    out = pl.pallas_call(
        _crelu_kernel,
        out_shape=jax.ShapeDtypeStruct((n, 2, rows, lanes), x.dtype),
        grid_spec=pltpu.PrefetchScalarGridSpec(
            num_scalar_prefetch=0,
            grid=grid,
            in_specs=[
                pl.BlockSpec((None, tile_r, tile_l), lambda i, j, s: (i, j, s)),
            ],
            out_specs=pl.BlockSpec(
                (None, 2, tile_r, tile_l), lambda i, j, s: (i, 0, j, s)
            ),
        ),
        compiler_params=pltpu.CompilerParams(
            # Every grid step is independent -> all parallel (v7x megacore).
            dimension_semantics=("parallel", "parallel", "parallel"),
            # Generation-aware: stays under v7x's 64 MiB physical VMEM while
            # allowing larger double-buffered tiles on v5e/v6e (128 MiB).
            vmem_limit_bytes=vmem_limit,
        ),
    )(x3)
    # (N, 2, rows, lanes) -> (N, 2C, H, W): again a pure contiguous view.
    return out.reshape(n, 2 * c, h, w)


def _crelu_ref(x):
    return jnp.maximum(jnp.concatenate([x, -x], axis=1), 0)


if __name__ == "__main__":
    key = jax.random.PRNGKey(0)

    # Primary check: small shape consistent with the module's CReLU usage.
    x = jax.random.normal(key, (2, 4, 16, 16), dtype=jnp.float32)
    out = jax.block_until_ready(crelu(x))
    assert out.shape == (2, 8, 16, 16), out.shape
    assert jnp.allclose(out, _crelu_ref(x)), "mismatch vs reference"

    k2, k3, k4 = jax.random.split(jax.random.PRNGKey(0), 3)

    # Dense path, multi-step grid with a partial (ragged) last row block:
    # rows = 144, forced tile_r = 40 -> 4 steps, last block has 24 rows.
    y = jax.random.normal(k2, (1, 12, 24, 64), dtype=jnp.float32)
    out_y = jax.block_until_ready(crelu(y, target_step_bytes=40 * 3 * 128 * 4))
    assert jnp.allclose(out_y, _crelu_ref(y)), "mismatch (dense, ragged rows)"

    # Fallback path: HW (=200) not a multiple of 128 AND tiled (tile_l=128),
    # so the final lane block is partial -> padded read / clipped write.
    z = jax.random.normal(k3, (2, 3, 10, 20), dtype=jnp.float32)
    out_z = jax.block_until_ready(crelu(z))
    assert jnp.allclose(out_z, _crelu_ref(z)), "mismatch (fallback, ragged lanes)"

    # anime4k-like CReLU input (channel=12), fully automatic tiling
    # (exercises the min-step / even-step shrink rule: 1 -> 4 grid steps).
    v = jax.random.normal(k4, (1, 12, 64, 96), dtype=jnp.float32)
    out_v = jax.block_until_ready(crelu(v))
    assert jnp.allclose(out_v, _crelu_ref(v)), "mismatch (dense, auto tiles)"

    print("KERNEL_OK")
</pallas_src>

<mosaic_0001>
module attributes {stable_mosaic.version = 11 : i64} {
  func.func @_crelu_kernel(%arg0: i32, %arg1: i32, %arg2: i32, %arg3: memref<1x8x128xf32, #tpu.memory_space<vmem>>, %arg4: memref<1x2x8x128xf32, #tpu.memory_space<vmem>>) attributes {dimension_semantics = [#tpu.dimension_semantics<parallel>, #tpu.dimension_semantics<parallel>, #tpu.dimension_semantics<parallel>], iteration_bounds = array<i64: 2, 1, 1>, scalar_prefetch = 0 : i64, scratch_operands = 0 : i64, tpu.core_type = #tpu.core_type<tc>, window_params = [{transform_indices = @transform_0, window_bounds = array<i64: 1, 8, 128>}, {transform_indices = @transform_1, window_bounds = array<i64: 1, 2, 8, 128>}]} {
    %c0 = arith.constant 0 : index
    %c0_0 = arith.constant 0 : index
    %c0_1 = arith.constant 0 : index
    %0 = vector.load %arg3[%c0, %c0_0, %c0_1] : memref<1x8x128xf32, #tpu.memory_space<vmem>>, vector<1x8x128xf32>
    %1 = vector.shape_cast %0 : vector<1x8x128xf32> to vector<8x128xf32>
    %cst = arith.constant 0.000000e+00 : f32
    %2 = vector.broadcast %cst : f32 to vector<8x128xf32>
    %3 = arith.maximumf %1, %2 : vector<8x128xf32>
    %c0_2 = arith.constant 0 : index
    %c0_3 = arith.constant 0 : index
    %c0_4 = arith.constant 0 : index
    %c0_5 = arith.constant 0 : index
    %4 = vector.load %arg4[%c0_2, %c0_3, %c0_4, %c0_5] : memref<1x2x8x128xf32, #tpu.memory_space<vmem>>, vector<1x1x8x128xf32>
    %5 = vector.shape_cast %4 : vector<1x1x8x128xf32> to vector<8x128xf32>
    %6 = vector.shape_cast %3 : vector<8x128xf32> to vector<1x1x8x128xf32>
    tpu.vector_store %arg4[%c0_2, %c0_3, %c0_4, %c0_5], %6 {strides = array<i32>} : memref<1x2x8x128xf32, #tpu.memory_space<vmem>>, vector<1x1x8x128xf32>,
    %cst_6 = arith.constant 0.000000e+00 : f32
    %7 = vector.broadcast %cst_6 : f32 to vector<8x128xf32>
    %8 = arith.subf %7, %1 : vector<8x128xf32>
    %cst_7 = arith.constant 0.000000e+00 : f32
    %9 = vector.broadcast %cst_7 : f32 to vector<8x128xf32>
    %10 = arith.maximumf %8, %9 : vector<8x128xf32>
    %c0_8 = arith.constant 0 : index
    %c1 = arith.constant 1 : index
    %c0_9 = arith.constant 0 : index
    %c0_10 = arith.constant 0 : index
    %11 = vector.load %arg4[%c0_8, %c1, %c0_9, %c0_10] : memref<1x2x8x128xf32, #tpu.memory_space<vmem>>, vector<1x1x8x128xf32>
    %12 = vector.shape_cast %11 : vector<1x1x8x128xf32> to vector<8x128xf32>
    %13 = vector.shape_cast %10 : vector<8x128xf32> to vector<1x1x8x128xf32>
    tpu.vector_store %arg4[%c0_8, %c1, %c0_9, %c0_10], %13 {strides = array<i32>} : memref<1x2x8x128xf32, #tpu.memory_space<vmem>>, vector<1x1x8x128xf32>,
    return
  }
  func.func @transform_0(%arg0: i32, %arg1: i32, %arg2: i32) -> (i32, i32, i32) {
    %c0_i32 = arith.constant 0 : i32
    return %arg0, %arg1, %arg2 : i32, i32, i32
  }
  func.func @transform_1(%arg0: i32, %arg1: i32, %arg2: i32) -> (i32, i32, i32, i32) {
    %c0_i32 = arith.constant 0 : i32
    %c0_i32_0 = arith.constant 0 : i32
    return %arg0, %c0_i32, %arg1, %arg2 : i32, i32, i32, i32
  }
}

</mosaic_0001>

<bundles_post_ra>
// kernel: tpu_custom_call.1
= control target key start
LH: loop header
LB: loop body
LE: loop exit
PB: predicated region body
PF: predicated region fallthrough
CT: control target
= control target key end

     0   :  { %6 = vsyncpa [#allocation3], 0  ;;  %s656_s0 = inlined_call_operand.hbm [shape: f32[2,8,128], index: 0, kind: input, shape index: {}]   ;;  %s657_s1 = inlined_call_operand.hbm [shape: f32[2,2,8,128], index: 1, kind: output, shape index: {}]  }
   0x1   :  { %8 = vsyncpa [#allocation3 + $0x1], 0 }
   0x2   :  { %9 = vsyncpa [#allocation4], 0 }
   0x3   :  { %11 = vsyncpa [#allocation4 + $0x1], 0  ;;  %s481_s6 = smov 0   ;;  %s483_s7 = smov 0  }
   0x4   :  { %s485_s8 = smov 0   ;;  %s487_s9 = smov 0  }
   0x5   :  { %s489_s10 = smov 0   ;;  %s491_s11 = smov 0  }
   0x6 LB: > { %s273_s12 = sadd.s32 4294967295, %s465_s11   ;;  %s274_s13 = sadd.s32 4294967294, %s465_s11   ;;  %s465_s11 = sphi %s491_s11, %s17_s11   ;;  %s461_s10 = sphi %s489_s10, %s673_s10   ;;  %s457_s9 = sphi %s487_s9, %s672_s9   ;;  %s453_s8 = sphi %s485_s8, %s671_s8   ;;  %s449_s7 = sphi %s483_s7, %s670_s7   ;;  %s445_s6 = sphi %s481_s6, %s669_s6  }
   0x7   : > { %s36_s14 = sadd.s32 1, %s461_s10  ;;  %s47_s15 = sadd.s32 1, %s453_s8 }
   0x8   : > { %p38_p0 = scmp.ge.s32.totalorder %s36_s14, 2  ;;  %p54_p1 = scmp.ne.s32.totalorder %s453_s8, %s449_s7 }
   0x9   : > { %p55_p2 = scmp.eq.s32.totalorder %s465_s11, 0  ;;  %p60_p3 = scmp.ne.s32.totalorder %s449_s7, %s445_s6 }
   0xa   : > { %s675_s14 = smov (%p38_p0, %s36_s14), 0  ;;  %p61_p5 = scmp.eq.s32.totalorder %s273_s12, 0 }
   0xb   : > { %p522_p4 = por %p55_p2, %p54_p1  ;;  %s40_s17 = ssub.s32 %s461_s10, %s675_s14 }
   0xc   : > { %p88_p6 = scmp.eq.s32.totalorder %s273_s12, 1  ;;  %p45_p7 = scmp.eq.s32.totalorder %s40_s17, 0 }
   0xd   : > { %p528_p8 = por %p61_p5, %p60_p3  ;;  %p94_p10 = scmp.eq.s32.totalorder %s274_s13, 1 }
   0xe   : > { %p532_p9 = por %p88_p6, %p54_p1  ;;  %p301_p13 = scmp.lt.s32.totalorder %s465_s11, 2 }
   0xf   : > { %s537_s20 = scalar_select %p45_p7, %s453_s8, %s47_s15  }
  0x10   : > { %s661_s19 = scalar_select %p532_p9, 1, 0 }
  0x11   : > { %p539_p11 = por %p94_p10, %p60_p3  ;;  %s114_s22 = sand.u32 1, %s453_s8  }
  0x12   : > { %s277_s23 = sshll.u32 %s114_s22, 3  ;;  %s278_s24 = sshll.u32 %s461_s10, 7 }
  0x13   : > { %s662_s21 = scalar_select %p539_p11, 1, 0 }
  0x14   : > { %s550_s27 = scalar_lea.hbm %s656_s0, %s278_s24  ;;  %s118_s28 = scalar_lea.vmem [#allocation2], %s277_s23 }
  0x15   : > { %s127_s29 = sshll.u32 %s118_s28, 4  ;;  %p556_p0 = pnand %p301_p13, %p522_p4  ;;  %s552_s29 = int_to_ptr.vmem [resolvable:$true] %s127_s29 }
  0x16   : > { %s115_s2 = scalar_lea.sflag [#allocation3], %s114_s22  ;;  %s353_s3 = scalar_lea.hbm %s550_s27, 128 }
  0x17   : > { %p354_p3 = scmp.ne.s32.totalorder %s550_s27, %s353_s3  ;;  %p355_p5 = pneg %p556_p0 }
  0x18   : > { %s358_s12 = scalar_lea.hbm %s656_s0, 256  ;;  %p359_p4 = scmp.lt.u32.totalorder %s550_s27, %s656_s0 }
  0x19   : > { %p356_p6 = pnand %p355_p5, %p354_p3  ;;  %p360_p10 = scmp.lt.u32.totalorder %s358_s12, %s353_s3 }
  0x1a   : > { %p362_p12 = scmp.lt.u32.totalorder %s353_s3, %s550_s27 }
  0x1b   : > { %p357_p7 = pneg %p356_p6  ;;  %p361_p13 = por %p360_p10, %p359_p4 }
  0x1d   : > { %p363_p1 = por %p362_p12, %p361_p13 }
  0x1f   : > { %p364_p2 = pnand %p363_p1, %p357_p7 }
  0x21   : > { %367 = shalt.err (!%p364_p2)
}
  0x22   : > { %s368_s16 = scalar_lea.vmem %s552_s29, 128  ;;  %s467_s17 = smov [#allocation2]  }
  0x23   : > { %p369_p3 = scmp.ne.s32.totalorder %s552_s29, %s368_s16  ;;  %s373_s22 = sshll.u32 %s467_s17, 4  ;;  %s374_s22 = int_to_ptr.vmem [resolvable:$false] %s373_s22 }
  0x24   : > { %s375_s23 = scalar_lea.vmem %s374_s22, 256  ;;  %p376_p9 = scmp.lt.s32.totalorder %s552_s29, %s374_s22 }
  0x25   : > { %p371_p6 = pnand %p369_p3, %p355_p5  ;;  %p377_p4 = scmp.lt.s32.totalorder %s375_s23, %s368_s16 }
  0x27   : > { %p372_p11 = pneg %p371_p6  ;;  %p378_p10 = por %p377_p4, %p376_p9 }
  0x29   : > { %p379_p12 = pnand %p378_p10, %p372_p11 }
  0x2b   : > { %382 = shalt.err (!%p379_p12)
}
  0x2c   : > { %296 = dma.hbm_to_vmem [thread:$0]  (!%p556_p0), %s550_s27, 128, %s552_s29, %s115_s2  }
  0x2d   : > { %p664_p1 = scmp.lt.s32.totalorder %s465_s11, 3  ;;  %p665_p2 = scmp.ge.s32.totalorder %s465_s11, 1 }
  0x2f   : > { %p133_p5 = pnand %p665_p2, %p664_p1 }
  0x30   : > { %s592_s24 = sand.u32 (!%p133_p5), 1, %s449_s7  }
  0x31   : > { %136 = sbr.rel (%p133_p5) target bundleno = 84 (0x54), region = 24  ;;  %s280_s25 = sshll.u32 (!%p133_p5), %s592_s24, 3 }
  0x32   : > { %s139_s26 = scalar_lea.sflag (!%p133_p5), [#allocation3], %s592_s24  ;;  %s142_s28 = scalar_lea.vmem (!%p133_p5), [#allocation2], %s280_s25 }
  0x38   : > { %436 = dma.done.wait (%p528_p8), %s139_s26, 128  }
  0x39   : > { %438 = vsyncadd (%p528_p8), %s139_s26, 4294967168  ;;  %s281_s27 = sshll.u32 %s592_s24, 4  ;;  %s288_s2 = sshll.u32 %s457_s9, 8  ;;  %v161_v0 = vld [vmem:[%s142_s28] sm:$0xff] }
  0x3a   : > { %s160_s29 = scalar_lea.vmem [#allocation5], %s281_s27  ;;  %v162_v1 = vmax.f32 %v161_v0, 0.0  ;;  %v164_v2 = vsub.f32 0.0, %v161_v0  ;;  %s607_s18 = scalar_lea.hbm %s657_s1, %s288_s2 }
  0x3b   : > { %s184_s30 = sshll.u32 %s160_s29, 4  ;;  %s169_s5 = scalar_lea.sflag [#allocation4], %s592_s24  ;;  %s602_s30 = int_to_ptr.vmem [resolvable:$true] %s184_s30 }
  0x3c   : > { %163 = vst [vmem:[%s160_s29] sm:$0xff] %v162_v1  ;;  %v165_v3 = vmax.f32 %v164_v2, 0.0  ;;  %s383_s12 = scalar_lea.vmem %s602_s30, 256  ;;  %p666_p9 = scmp.ne.s32.totalorder %s661_s19, 0 }
  0x3d   : > { %p384_p8 = scmp.ne.s32.totalorder %s602_s30, %s383_s12  ;;  %s468_s9 = smov [#allocation5]  }
  0x3e   : > { %282 = vst [vmem:[%s160_s29 + $0x8] sm:$0xff] %v165_v3  ;;  %s387_s13 = sshll.u32 %s468_s9, 4  ;;  %s388_s13 = int_to_ptr.vmem [resolvable:$false] %s387_s13 }
  0x3f   : > { %p385_p11 = pnand %p384_p8, %p666_p9  ;;  %s389_s15 = scalar_lea.vmem %s388_s13, 512 }
  0x40   : > { %p390_p7 = scmp.lt.s32.totalorder %s602_s30, %s388_s13  ;;  %p391_p13 = scmp.lt.s32.totalorder %s389_s15, %s383_s12 }
  0x41   : > { %p386_p0 = pneg %p385_p11 }
  0x42   : > { %p392_p3 = por %p391_p13, %p390_p7 }
  0x44   : > { %p393_p6 = pnand %p392_p3, %p386_p0 }
  0x46   : > { %396 = shalt.err (!%p393_p6)
}
  0x47   : > { %s397_s16 = scalar_lea.hbm %s607_s18, 256  ;;  %s401_s23 = scalar_lea.hbm %s657_s1, 512 }
  0x48   : > { %p398_p4 = scmp.ne.s32.totalorder %s607_s18, %s397_s16  ;;  %p402_p1 = scmp.lt.u32.totalorder %s607_s18, %s657_s1 }
  0x49   : > { %p403_p2 = scmp.lt.u32.totalorder %s401_s23, %s397_s16  ;;  %p405_p8 = scmp.lt.u32.totalorder %s397_s16, %s607_s18 }
  0x4a   : > { %p399_p10 = pnand %p398_p4, %p666_p9 }
  0x4b   : > { %p404_p5 = por %p403_p2, %p402_p1 }
  0x4c   : > { %p400_p12 = pneg %p399_p10 }
  0x4d   : > { %p406_p11 = por %p405_p8, %p404_p5 }
  0x4f   : > { %p407_p0 = pnand %p406_p11, %p400_p12 }
  0x51   : > { %410 = shalt.err (!%p407_p0)
}
  0x52   : > { %s469_s28 = smov 128   ;;  %s470_s27 = smov 8  }
  0x53   : > { %291 = dma.vmem_to_hbm [thread:$0]  (%p666_p9), %s602_s30, 256, %s607_s18, %s169_s5, %s469_s28, %s469_s28, %s470_s27  }
  0x54 PF: > { %s199_s29 = sand.u32 1, %s445_s6   ;;  %p667_p7 = scmp.ne.s32.totalorder %s662_s21, 0 }
  0x55   : > { %p668_p13 = scmp.ge.s32.totalorder %s465_s11, 2  ;;  %s200_s2 = scalar_lea.sflag [#allocation4], %s199_s29 }
  0x57   : > { %p298_p3 = pnand %p668_p13, %p667_p7 }
  0x59   : > { %440 = dma.done.wait (!%p298_p3), %s200_s2, 256  }
  0x5a   : > { %442 = vsyncadd (!%p298_p3), %s200_s2, 4294967040  ;;  %s17_s11 = sadd.s32 1, %s465_s11   ;;  %s669_s6 = smov %s449_s7 }
  0x5b   : > { %p14_p6 = scmp.ge.s32.totalorder %s17_s11, 4   ;;  %s670_s7 = smov %s453_s8 }
  0x5c   : > { %s671_s8 = smov %s537_s20  ;;  %s672_s9 = smov %s461_s10 }
  0x5d   : > { %s673_s10 = smov %s675_s14  ;;  %16 = sbr.rel (!%p14_p6) target bundleno = 6 (0x6), region = 70 }
  0x64   :  { %205 = vsyncpa [#allocation3], 1 }
  0x65   :  { %207 = vsyncpa [#allocation3 + $0x1], 1 }
  0x66   :  { %208 = vsyncpa [#allocation4], 1 }
  0x67   :  { %210 = vsyncpa [#allocation4 + $0x1], 1 }

</bundles_post_ra>
